<compile_context>
chip_gen: v5e
topology: v5e:2x2
jax: 0.10.0
libtpu: 0.0.40
codegen_flags: <defaults>
</compile_context>

<pallas_src>
import functools

import jax
import jax.numpy as jnp
from jax.experimental import pallas as pl
from jax.experimental.pallas import tpu as pltpu

_NEG_BIG = -1e30   # bias on padded action lanes (exp underflows to exactly 0)
_C = 3             # xyz coordinates per atom


def _round_up(x, m):
    return ((x + m - 1) // m) * m


# ---------------------------------------------------------------------------
# Fused Pallas kernel: encoder matmul + MLPwoLastAct (MXU) + exact softmax
# ---------------------------------------------------------------------------

def _actor_kernel(s_ref, bias_ref, *w_refs_and_out):
    """One batch tile of the full Actor forward.

    s_ref    : (tb, N*3)          f32  flattened state tile
    bias_ref : (n_layers, Wmax)   f32  packed per-layer biases (last row has
                                       -1e30 on padded action lanes)
    w_refs   : n_layers bf16 weight matrices (lane-dense, widths padded to 128)
    out_ref  : (tb, Apad)         f32  softmax probabilities (padded lanes = 0)
    """
    out_ref = w_refs_and_out[-1]
    w_refs = w_refs_and_out[:-1]
    n_layers = len(w_refs)

    h = s_ref[...]                                      # f32 (tb, N*3)
    for i in range(n_layers):
        w_ref = w_refs[i]
        fo = w_ref.shape[-1]
        h = (jnp.dot(h.astype(w_ref.dtype), w_ref[...],
                     preferred_element_type=jnp.float32)
             + bias_ref[i:i + 1, :fo])
        if i < n_layers - 1:
            h = jnp.maximum(h, 0.0)                     # encoder + hidden ReLUs only

    # Numerically-stable softmax in f32 over the lane-dense padded axis.
    # Padded action lanes have a -1e30 bias -> exp == 0 -> real probs exact.
    m = jnp.max(h, axis=-1, keepdims=True)
    e = jnp.exp(h - m)
    denom = jnp.sum(e, axis=-1, keepdims=True)
    out_ref[...] = e / denom                            # exact normalization


# ---------------------------------------------------------------------------
# Wrapper: one fused pallas_call, batch tiled on a "parallel" grid axis
# ---------------------------------------------------------------------------

@functools.partial(jax.jit, static_argnames=("action_choices",))
def actor_forward(state, params, *, action_choices):
    B, N, C = state.shape                               # C == 3 (xyz)
    s2 = state.reshape(B, N * C).astype(jnp.float32)

    bias = params["bias"]                               # [n_layers, Wmax] f32
    w_list = list(params["weights"])                    # bf16, lane-dense widths
    apad = int(w_list[-1].shape[-1])
    wmax = max(int(w.shape[-1]) for w in w_list)

    # Batch tile: large (grid-step overhead dominates for this tiny net), but
    # >= 2 grid steps when B is big so v7x's two TensorCores both get work.
    if B <= 8:
        tb = B
    else:
        tb = min(1024, _round_up((B + 1) // 2, 8))
    grid = (pl.cdiv(B, tb),)

    in_specs = (
        [pl.BlockSpec((tb, N * C), lambda i: (i, 0)),
         pl.BlockSpec(bias.shape, lambda i: (0, 0))]
        + [pl.BlockSpec(w.shape, lambda i: (0, 0)) for w in w_list]
    )
    out_specs = pl.BlockSpec((tb, apad), lambda i: (i, 0))
    out_shape = jax.ShapeDtypeStruct((B, apad), jnp.float32)

    # Honest per-tile VMEM budget: resident weights (x1, constant index maps)
    # + double-buffered input/output tiles + a few activation temps + headroom.
    weight_bytes = (sum(int(w.size) * w.dtype.itemsize for w in w_list)
                    + int(bias.size) * bias.dtype.itemsize)
    io_bytes = 2 * tb * N * C * 4 + 2 * tb * apad * 4
    act_bytes = 4 * tb * wmax * 4
    vmem_limit = int(min(max(weight_bytes + io_bytes + act_bytes + (2 << 20),
                             4 << 20), 32 << 20))

    prob_padded = pl.pallas_call(
        _actor_kernel,
        grid=grid,
        in_specs=in_specs,
        out_specs=out_specs,
        out_shape=out_shape,
        compiler_params=pltpu.CompilerParams(
            dimension_semantics=("parallel",),
            vmem_limit_bytes=vmem_limit,
        ),
    )(s2, bias, *w_list)

    # Consumers that can read the padded (B, apad) slab may skip this slice.
    return prob_padded[:, :action_choices]


# ---------------------------------------------------------------------------
# Deterministic parameter init (mirrors Actor.weight_init: xavier W, 0 bias)
# ---------------------------------------------------------------------------

def _xavier_uniform(key, fan_in, fan_out):
    bound = float(jnp.sqrt(6.0 / (fan_in + fan_out)))
    return jax.random.uniform(key, (fan_in, fan_out), jnp.float32, -bound, bound)


def init_actor_params(key, *, num_atoms, latent_size, mlp_hidden_size, mlp_layers,
                      action_choices):
    C = _C
    nl = num_atoms * latent_size
    nlp = _round_up(nl, 128)                 # encoder-output width, lane-dense
    hp = _round_up(mlp_hidden_size, 128)     # hidden width, lane-dense
    ap = _round_up(action_choices, 128)      # action width, lane-dense

    sizes = [nl] + [mlp_hidden_size] * mlp_layers + [action_choices]
    pin = [nlp] + [hp] * mlp_layers          # padded fan-in per MLP layer
    pout = [hp] * mlp_layers + [ap]          # padded fan-out per MLP layer
    n_linear = len(sizes) - 1
    keys = jax.random.split(key, n_linear + 1)

    # GNN stand-in: shared per-atom linear(3 -> latent) assembled into a
    # block-diagonal [N*3, nlp] matrix so the encoder runs as ONE MXU matmul.
    wenc_small = _xavier_uniform(keys[0], C, latent_size)
    wenc = jnp.zeros((num_atoms * C, nlp), jnp.float32)
    for n in range(num_atoms):
        wenc = wenc.at[n * C:(n + 1) * C,
                       n * latent_size:(n + 1) * latent_size].set(wenc_small)

    weights = [wenc.astype(jnp.bfloat16)]
    for i in range(n_linear):
        w = _xavier_uniform(keys[1 + i], sizes[i], sizes[i + 1])
        wpad = jnp.zeros((pin[i], pout[i]), jnp.float32)
        wpad = wpad.at[:sizes[i], :sizes[i + 1]].set(w)   # zero-pad rows & cols
        weights.append(wpad.astype(jnp.bfloat16))

    # Packed biases: row 0 = encoder, rows 1..n_linear = MLP layers (all zero
    # per weight_init); last row gets -1e30 on padded action lanes.
    n_layers = 1 + n_linear
    wmax = max(nlp, hp, ap)
    bias = jnp.zeros((n_layers, wmax), jnp.float32)
    last_row = jnp.full((wmax,), _NEG_BIG, jnp.float32).at[:action_choices].set(0.0)
    bias = bias.at[n_layers - 1].set(last_row)

    return {"bias": bias, "weights": weights}


# ---------------------------------------------------------------------------
# Demo
# ---------------------------------------------------------------------------

if __name__ == "__main__":
    BATCH = 2
    NUM_ATOMS = 4
    LATENT = 32
    HIDDEN = 32
    MLP_LAYERS = 2
    ACTIONS = 8

    root = jax.random.PRNGKey(0)
    k_state, k_params = jax.random.split(root)

    state_batch = jax.random.normal(k_state, (BATCH, NUM_ATOMS, 3), jnp.float32)
    params = init_actor_params(
        k_params,
        num_atoms=NUM_ATOMS,
        latent_size=LATENT,
        mlp_hidden_size=HIDDEN,
        mlp_layers=MLP_LAYERS,
        action_choices=ACTIONS,
    )

    prob = actor_forward(state_batch, params, action_choices=ACTIONS)
    prob = jax.block_until_ready(prob)

    assert prob.shape == (BATCH, ACTIONS)
    assert bool(jnp.all(jnp.isfinite(prob)))
    assert bool(jnp.all(prob >= 0.0))
    # exact divide in the kernel -> rows sum to 1 to f32 precision
    assert bool(jnp.allclose(jnp.sum(prob, axis=1), 1.0, atol=1e-5))

    print("KERNEL_OK")
</pallas_src>

<mosaic_0001>
module attributes {stable_mosaic.version = 11 : i64} {
  func.func @_actor_kernel(%arg0: i32, %arg1: memref<2x12xf32, #tpu.memory_space<vmem>>, %arg2: memref<4x128xf32, #tpu.memory_space<vmem>>, %arg3: memref<12x128xbf16, #tpu.memory_space<vmem>>, %arg4: memref<128x128xbf16, #tpu.memory_space<vmem>>, %arg5: memref<128x128xbf16, #tpu.memory_space<vmem>>, %arg6: memref<128x128xbf16, #tpu.memory_space<vmem>>, %arg7: memref<2x128xf32, #tpu.memory_space<vmem>>) attributes {dimension_semantics = [#tpu.dimension_semantics<parallel>], iteration_bounds = array<i64: 1>, scalar_prefetch = 0 : i64, scratch_operands = 0 : i64, tpu.core_type = #tpu.core_type<tc>, window_params = [{transform_indices = @transform_0, window_bounds = array<i64: 2, 12>}, {pipeline_mode = #tpu.pipeline_mode<synchronous>, transform_indices = @transform_1, window_bounds = array<i64: 4, 128>}, {pipeline_mode = #tpu.pipeline_mode<synchronous>, transform_indices = @transform_2, window_bounds = array<i64: 12, 128>}, {pipeline_mode = #tpu.pipeline_mode<synchronous>, transform_indices = @transform_3, window_bounds = array<i64: 128, 128>}, {pipeline_mode = #tpu.pipeline_mode<synchronous>, transform_indices = @transform_4, window_bounds = array<i64: 128, 128>}, {pipeline_mode = #tpu.pipeline_mode<synchronous>, transform_indices = @transform_5, window_bounds = array<i64: 128, 128>}, {transform_indices = @transform_6, window_bounds = array<i64: 2, 128>}]} {
    %c0 = arith.constant 0 : index
    %c0_0 = arith.constant 0 : index
    %0 = vector.load %arg1[%c0, %c0_0] : memref<2x12xf32, #tpu.memory_space<vmem>>, vector<2x12xf32>
    %1 = arith.truncf %0 : vector<2x12xf32> to vector<2x12xbf16>
    %c0_1 = arith.constant 0 : index
    %c0_2 = arith.constant 0 : index
    %2 = vector.load %arg3[%c0_1, %c0_2] : memref<12x128xbf16, #tpu.memory_space<vmem>>, vector<12x128xbf16>
    %cst = arith.constant dense<0.000000e+00> : vector<2x128xf32>
    %3 = tpu.matmul %1, %2, %cst {dimension_numbers = #tpu.dot_dimension_numbers<[1], [0], [0], [1], [0, 0, 1, 1], [], []>} : vector<2x12xbf16>, vector<12x128xbf16>, vector<2x128xf32> -> vector<2x128xf32>
    %c0_3 = arith.constant 0 : index
    %c0_4 = arith.constant 0 : index
    %4 = vector.load %arg2[%c0_3, %c0_4] : memref<4x128xf32, #tpu.memory_space<vmem>>, vector<1x128xf32>
    %5 = vector.broadcast %4 : vector<1x128xf32> to vector<2x128xf32>
    %6 = arith.addf %3, %5 : vector<2x128xf32>
    %cst_5 = arith.constant 0.000000e+00 : f32
    %7 = vector.broadcast %cst_5 : f32 to vector<2x128xf32>
    %8 = arith.maximumf %6, %7 : vector<2x128xf32>
    %9 = arith.truncf %8 : vector<2x128xf32> to vector<2x128xbf16>
    %c0_6 = arith.constant 0 : index
    %c0_7 = arith.constant 0 : index
    %10 = vector.load %arg4[%c0_6, %c0_7] : memref<128x128xbf16, #tpu.memory_space<vmem>>, vector<128x128xbf16>
    %cst_8 = arith.constant dense<0.000000e+00> : vector<2x128xf32>
    %11 = tpu.matmul %9, %10, %cst_8 {dimension_numbers = #tpu.dot_dimension_numbers<[1], [0], [0], [1], [0, 0, 1, 1], [], []>} : vector<2x128xbf16>, vector<128x128xbf16>, vector<2x128xf32> -> vector<2x128xf32>
    %c1 = arith.constant 1 : index
    %c0_9 = arith.constant 0 : index
    %12 = vector.load %arg2[%c1, %c0_9] : memref<4x128xf32, #tpu.memory_space<vmem>>, vector<1x128xf32>
    %13 = vector.broadcast %12 : vector<1x128xf32> to vector<2x128xf32>
    %14 = arith.addf %11, %13 : vector<2x128xf32>
    %cst_10 = arith.constant 0.000000e+00 : f32
    %15 = vector.broadcast %cst_10 : f32 to vector<2x128xf32>
    %16 = arith.maximumf %14, %15 : vector<2x128xf32>
    %17 = arith.truncf %16 : vector<2x128xf32> to vector<2x128xbf16>
    %c0_11 = arith.constant 0 : index
    %c0_12 = arith.constant 0 : index
    %18 = vector.load %arg5[%c0_11, %c0_12] : memref<128x128xbf16, #tpu.memory_space<vmem>>, vector<128x128xbf16>
    %cst_13 = arith.constant dense<0.000000e+00> : vector<2x128xf32>
    %19 = tpu.matmul %17, %18, %cst_13 {dimension_numbers = #tpu.dot_dimension_numbers<[1], [0], [0], [1], [0, 0, 1, 1], [], []>} : vector<2x128xbf16>, vector<128x128xbf16>, vector<2x128xf32> -> vector<2x128xf32>
    %c2 = arith.constant 2 : index
    %c0_14 = arith.constant 0 : index
    %20 = vector.load %arg2[%c2, %c0_14] : memref<4x128xf32, #tpu.memory_space<vmem>>, vector<1x128xf32>
    %21 = vector.broadcast %20 : vector<1x128xf32> to vector<2x128xf32>
    %22 = arith.addf %19, %21 : vector<2x128xf32>
    %cst_15 = arith.constant 0.000000e+00 : f32
    %23 = vector.broadcast %cst_15 : f32 to vector<2x128xf32>
    %24 = arith.maximumf %22, %23 : vector<2x128xf32>
    %25 = arith.truncf %24 : vector<2x128xf32> to vector<2x128xbf16>
    %c0_16 = arith.constant 0 : index
    %c0_17 = arith.constant 0 : index
    %26 = vector.load %arg6[%c0_16, %c0_17] : memref<128x128xbf16, #tpu.memory_space<vmem>>, vector<128x128xbf16>
    %cst_18 = arith.constant dense<0.000000e+00> : vector<2x128xf32>
    %27 = tpu.matmul %25, %26, %cst_18 {dimension_numbers = #tpu.dot_dimension_numbers<[1], [0], [0], [1], [0, 0, 1, 1], [], []>} : vector<2x128xbf16>, vector<128x128xbf16>, vector<2x128xf32> -> vector<2x128xf32>
    %c3 = arith.constant 3 : index
    %c0_19 = arith.constant 0 : index
    %28 = vector.load %arg2[%c3, %c0_19] : memref<4x128xf32, #tpu.memory_space<vmem>>, vector<1x128xf32>
    %29 = vector.broadcast %28 : vector<1x128xf32> to vector<2x128xf32>
    %30 = arith.addf %27, %29 : vector<2x128xf32>
    %cst_20 = arith.constant dense<0xFF800000> : vector<2xf32>
    %31 = vector.multi_reduction <maximumf>, %30, %cst_20 [1] : vector<2x128xf32> to vector<2xf32>
    %32 = vector.shape_cast %31 : vector<2xf32> to vector<2x1xf32>
    %33 = vector.broadcast %32 : vector<2x1xf32> to vector<2x128xf32>
    %34 = arith.subf %30, %33 : vector<2x128xf32>
    %35 = math.exp %34 : vector<2x128xf32>
    %cst_21 = arith.constant dense<0.000000e+00> : vector<2xf32>
    %36 = vector.multi_reduction <add>, %35, %cst_21 [1] : vector<2x128xf32> to vector<2xf32>
    %37 = vector.shape_cast %36 : vector<2xf32> to vector<2x1xf32>
    %38 = vector.broadcast %37 : vector<2x1xf32> to vector<2x128xf32>
    %39 = arith.divf %35, %38 : vector<2x128xf32>
    %c0_22 = arith.constant 0 : index
    %c0_23 = arith.constant 0 : index
    %40 = vector.load %arg7[%c0_22, %c0_23] : memref<2x128xf32, #tpu.memory_space<vmem>>, vector<2x128xf32>
    tpu.vector_store %arg7[%c0_22, %c0_23], %39 {strides = array<i32>} : memref<2x128xf32, #tpu.memory_space<vmem>>, vector<2x128xf32>,
    return
  }
  func.func @transform_0(%arg0: i32) -> (i32, i32) {
    %c0_i32 = arith.constant 0 : i32
    %c0_i32_0 = arith.constant 0 : i32
    return %arg0, %c0_i32 : i32, i32
  }
  func.func @transform_1(%arg0: i32) -> (i32, i32) {
    %c0_i32 = arith.constant 0 : i32
    %c0_i32_0 = arith.constant 0 : i32
    %c0_i32_1 = arith.constant 0 : i32
    return %c0_i32, %c0_i32_0 : i32, i32
  }
  func.func @transform_2(%arg0: i32) -> (i32, i32) {
    %c0_i32 = arith.constant 0 : i32
    %c0_i32_0 = arith.constant 0 : i32
    %c0_i32_1 = arith.constant 0 : i32
    return %c0_i32, %c0_i32_0 : i32, i32
  }
  func.func @transform_3(%arg0: i32) -> (i32, i32) {
    %c0_i32 = arith.constant 0 : i32
    %c0_i32_0 = arith.constant 0 : i32
    %c0_i32_1 = arith.constant 0 : i32
    return %c0_i32, %c0_i32_0 : i32, i32
  }
  func.func @transform_4(%arg0: i32) -> (i32, i32) {
    %c0_i32 = arith.constant 0 : i32
    %c0_i32_0 = arith.constant 0 : i32
    %c0_i32_1 = arith.constant 0 : i32
    return %c0_i32, %c0_i32_0 : i32, i32
  }
  func.func @transform_5(%arg0: i32) -> (i32, i32) {
    %c0_i32 = arith.constant 0 : i32
    %c0_i32_0 = arith.constant 0 : i32
    %c0_i32_1 = arith.constant 0 : i32
    return %c0_i32, %c0_i32_0 : i32, i32
  }
  func.func @transform_6(%arg0: i32) -> (i32, i32) {
    %c0_i32 = arith.constant 0 : i32
    %c0_i32_0 = arith.constant 0 : i32
    return %arg0, %c0_i32 : i32, i32
  }
}

</mosaic_0001>

<bundles_post_ra>
// kernel: actor_forward.1
= control target key start
LH: loop header
LB: loop body
LE: loop exit
PB: predicated region body
PF: predicated region fallthrough
CT: control target
= control target key end

     0   :  { %11 = vsyncpa [#allocation3], 0  ;;  %s707_s0 = inlined_call_operand.vmem [shape: f32[2,12], index: 0, kind: input, shape index: {}]   ;;  %s708_s1 = inlined_call_operand.vmem [shape: f32[4,128], index: 1, kind: input, shape index: {}]   ;;  %s709_s2 = inlined_call_operand.vmem [shape: bf16[12,128], index: 2, kind: input, shape index: {}]   ;;  %s710_s3 = inlined_call_operand.hbm [shape: bf16[128,128], index: 3, kind: input, shape index: {}]   ;;  %s711_s4 = inlined_call_operand.hbm [shape: bf16[128,128], index: 4, kind: input, shape index: {}]   ;;  %s712_s5 = inlined_call_operand.hbm [shape: bf16[128,128], index: 5, kind: input, shape index: {}]   ;;  %s713_s6 = inlined_call_operand.hbm [shape: f32[2,128], index: 6, kind: output, shape index: {}]  }
   0x1   :  { %12 = vsyncpa [#allocation6], 0 }
   0x2   :  { %13 = vsyncpa [#allocation4], 0  ;;  %s37_s23 = sshll.u32 %s711_s4, 4  ;;  %s633_s24 = smov [#allocation5]   ;;  %s38_s23 = int_to_ptr.hbm [resolvable:$true] %s37_s23 }
   0x3   :  { %s39_s25 = sshll.u32 %s633_s24, 4  ;;  %s24_s28 = sshll.u32 %s710_s3, 4  ;;  %s40_s25 = int_to_ptr.vmem [resolvable:$true] %s39_s25  ;;  %s25_s28 = int_to_ptr.hbm [resolvable:$true] %s24_s28 }
   0x4   :  { %s634_s29 = smov 64   ;;  %s635_s30 = smov 4  }
   0x5   :  { %45 = dma.hbm_to_vmem [thread:$0]  %s38_s23, 1024, %s40_s25, [#allocation6], %s634_s29, %s634_s29, %s635_s30  }
   0x6   :  { %s636_s7 = smov [#allocation2]   ;;  %s50_s11 = sshll.u32 %s712_s5, 4  ;;  %s51_s11 = int_to_ptr.hbm [resolvable:$true] %s50_s11 }
   0x7   :  { %s26_s8 = sshll.u32 %s636_s7, 4  ;;  %s637_s4 = smov [#allocation7]   ;;  %s27_s8 = int_to_ptr.vmem [resolvable:$true] %s26_s8 }
   0x8   :  { %32 = dma.hbm_to_vmem [thread:$0]  %s25_s28, 1024, %s27_s8, [#allocation3], %s634_s29, %s634_s29, %s635_s30  }
   0x9   :  { %s52_s12 = sshll.u32 %s637_s4, 4  ;;  %s53_s12 = int_to_ptr.vmem [resolvable:$true] %s52_s12 }
   0xa   :  { %58 = dma.hbm_to_vmem [thread:$0]  %s51_s11, 1024, %s53_s12, [#allocation6], %s634_s29, %s634_s29, %s635_s30  }
   0xb   :  { %627 = dma.done.wait [#allocation3], 1024  }
   0xc   :  { %628 = vsyncadd [#allocation3], 4294966272 }
   0xd   :  { %629 = dma.done.wait [#allocation6], 2048  }
   0xe   :  { %630 = vsyncadd [#allocation6], 4294965248  ;;  %vm87_vm0 = vcmask 1045504   ;;  %v393_v0 = vld [vmem:[%s709_s2] sm:$0xf]  ;;  %v500_v4 = vld [vmem:[#allocation2 + $0x38] sm:$0xff] }
   0xf   :  { %v492_v1 = vld [vmem:[%s709_s2] sm:$0x30]  ;;  %v72_v2 = vld [vmem:[%s707_s0] sm:$0x3]  ;;  %vm83_vm1 = vcmask 97280   ;;  %172 = vmatpush.bf16.msra.mxu1 %v500_v4  ;;  %v499_v7 = vld [vmem:[#allocation2 + $0x30] sm:$0xff] }
  0x10   :  { %v394_v3 = vor.u32 %v492_v1, %v393_v0  ;;  %v73_v6 = vpack.c.bf16 %v72_v2, %v72_v2  ;;  %v498_v8 = vld [vmem:[#allocation2 + $0x28] sm:$0xff]  ;;  %v497_v9 = vld [vmem:[#allocation2 + $0x20] sm:$0xff]  ;;  %v496_v10 = vld [vmem:[#allocation2 + $0x18] sm:$0xff]  ;;  %vm347_vm2 = vcmask 1041408   ;;  %s380_s26 = sshll.u32 %s713_s6, 4  ;;  %s381_s26 = int_to_ptr.hbm [resolvable:$true] %s380_s26 }
  0x11   :  { %v495_v11 = vld [vmem:[#allocation2 + $0x10] sm:$0xff]  ;;  %v494_v12 = vld [vmem:[#allocation2 + $0x8] sm:$0xff]  ;;  %v493_v13 = vld [vmem:[#allocation2] sm:$0xff] }
  0x12   :  { %v89_v5 = vsel %vm87_vm0, %v394_v3, 0  ;;  %v508_v14 = vld [vmem:[#allocation5 + $0x38] sm:$0xff]  ;;  %v507_v15 = vld [vmem:[#allocation5 + $0x30] sm:$0xff]  ;;  %v506_v16 = vld [vmem:[#allocation5 + $0x28] sm:$0xff] }
  0x13   :  { %98 = vmatpush.bf16.msra.mxu0 %v89_v5  ;;  %173 = vmatpush.bf16.msra.mxu1 %v499_v7  ;;  %v505_v17 = vld [vmem:[#allocation5 + $0x20] sm:$0xff]  ;;  %v504_v18 = vld [vmem:[#allocation5 + $0x18] sm:$0xff]  ;;  %v503_v19 = vld [vmem:[#allocation5 + $0x10] sm:$0xff] }
  0x14   :  { %253 = vmatpush.bf16.msra.mxu2 %v508_v14  ;;  %v523_v20 = vld [vmem:[%s708_s1] ss:$0 sm:$0xff]  ;;  %v502_v26 = vld [vmem:[#allocation5 + $0x8] sm:$0xff]  ;;  %v516_v28 = vld [vmem:[#allocation7 + $0x38] sm:$0xff] }
  0x15   :  { %v501_v27 = vld [vmem:[#allocation5] sm:$0xff]  ;;  %334 = vmatpush.bf16.msra.mxu3 %v516_v28  ;;  %v515_v29 = vld [vmem:[#allocation7 + $0x30] sm:$0xff]  ;;  %v514_v30 = vld [vmem:[#allocation7 + $0x28] sm:$0xff] }
  0x16   :  { %395 = vmatmul.msk.bf16.vlgmr.msra.gmra.mxu0 %vm83_vm1, %v73_v6  ;;  %v513_v31 = vld [vmem:[#allocation7 + $0x20] sm:$0xff]  ;;  %v512_v32 = vld [vmem:[#allocation7 + $0x18] sm:$0xff]  ;;  %v511_v33 = vld [vmem:[#allocation7 + $0x10] sm:$0xff] }
  0x17   :  { %174 = vmatpush.bf16.msra.mxu1 %v498_v8  ;;  %v524_v34 = vld [vmem:[%s708_s1 + $0x1] ss:$0 sm:$0xff]  ;;  %v510_v40 = vld [vmem:[#allocation7 + $0x8] sm:$0xff]  ;;  %v525_v42 = vld [vmem:[%s708_s1 + $0x2] ss:$0 sm:$0xff] }
  0x18   :  { %254 = vmatpush.bf16.msra.mxu2 %v507_v15  ;;  %v509_v41 = vld [vmem:[#allocation7] sm:$0xff] }
  0x19   :  { %335 = vmatpush.bf16.msra.mxu3 %v515_v29  ;;  %v526_v48 = vld [vmem:[%s708_s1 + $0x3] ss:$0 sm:$0xff]  ;;  %s638_s1 = smov [#allocation8]  }
  0x1a   :  { %s378_s23 = sshll.u32 %s638_s1, 4  ;;  %s379_s23 = int_to_ptr.vmem [resolvable:$true] %s378_s23 }
  0x1b   :  { %175 = vmatpush.bf16.msra.mxu1 %v497_v9 }
  0x1c   :  { %255 = vmatpush.bf16.msra.mxu2 %v506_v16 }
  0x1d   :  { %336 = vmatpush.bf16.msra.mxu3 %v514_v30 }
  0x1f   :  { %176 = vmatpush.bf16.msra.mxu1 %v496_v10 }
  0x20   :  { %256 = vmatpush.bf16.msra.mxu2 %v505_v17 }
  0x21   :  { %337 = vmatpush.bf16.msra.mxu3 %v513_v31 }
  0x23   :  { %177 = vmatpush.bf16.msra.mxu1 %v495_v11 }
  0x24   :  { %257 = vmatpush.bf16.msra.mxu2 %v504_v18 }
  0x25   :  { %338 = vmatpush.bf16.msra.mxu3 %v512_v32 }
  0x27   :  { %178 = vmatpush.bf16.msra.mxu1 %v494_v12 }
  0x28   :  { %258 = vmatpush.bf16.msra.mxu2 %v503_v19 }
  0x29   :  { %339 = vmatpush.bf16.msra.mxu3 %v511_v33 }
  0x2b   :  { %179 = vmatpush.bf16.msra.mxu1 %v493_v13 }
  0x2c   :  { %259 = vmatpush.bf16.msra.mxu2 %v502_v26 }
  0x2d   :  { %340 = vmatpush.bf16.msra.mxu3 %v510_v40 }
  0x30   :  { %260 = vmatpush.bf16.msra.mxu2 %v501_v27 }
  0x31   :  { %341 = vmatpush.bf16.msra.mxu3 %v509_v41 }
  0x93   :  { %v100_v21 = vpop.f32.mrf.mxu0 }
  0x94   :  { %v101_v22 = vadd.f32 %v523_v20, %v100_v21 }
  0x96   :  { %v104_v23 = vmax.f32 %v101_v22, 0.0 }
  0x98   :  { %v105_v24 = vpack.c.bf16 %v104_v23, %v104_v23 }
  0x9a   :  { %180 = vmatmul.bf16.vlgmr.msra.gmra.mxu1 %v105_v24 }
  0x9b   :  { %v102_v25 = vpop.f32.mrf.mxu0 }
 0x117   :  { %v181_v35 = vpop.f32.mrf.mxu1 }
 0x118   :  { %v182_v36 = vadd.f32 %v524_v34, %v181_v35 }
 0x11a   :  { %v185_v37 = vmax.f32 %v182_v36, 0.0 }
 0x11c   :  { %v186_v38 = vpack.c.bf16 %v185_v37, %v185_v37 }
 0x11e   :  { %261 = vmatmul.bf16.vlgmr.msra.gmra.mxu2 %v186_v38 }
 0x11f   :  { %v183_v39 = vpop.f32.mrf.mxu1 }
 0x1a1   :  { %v262_v43 = vpop.f32.mrf.mxu2 }
 0x1a2   :  { %v263_v44 = vadd.f32 %v525_v42, %v262_v43 }
 0x1a4   :  { %v266_v45 = vmax.f32 %v263_v44, 0.0 }
 0x1a6   :  { %v267_v46 = vpack.c.bf16 %v266_v45, %v266_v45 }
 0x1a8   :  { %342 = vmatmul.bf16.vlgmr.msra.gmra.mxu3 %v267_v46 }
 0x1a9   :  { %v264_v47 = vpop.f32.mrf.mxu2 }
 0x22b   :  { %v343_v49 = vpop.f32.mrf.mxu3 }
 0x22c   :  { %v344_v50 = vadd.f32 %v526_v48, %v343_v49 }
 0x22e   :  { %v348_v51 = vsel %vm347_vm2, %v344_v50, -inf }
 0x22f   :  { %349 = vmax.xlane.f32.xlu0 %v348_v51 }
 0x233   :  { %v345_v52 = vpop.f32.mrf.mxu3 }
 0x2a2   :  { %v350_v53 = vpop.xlane.xlu0 %349 }
 0x2a3   :  { %v351_v54 = vsub.f32 %v344_v50, %v350_v53 }
 0x2a5   :  { %v352_v55 = vmul.f32 1.442695, %v351_v54 }
 0x2a7   :  { %527 = vpow2.f32 %v352_v55 }
 0x2ad   :  { %v528_v56 = vpop.eup %527 }
 0x2ae   :  { %v354_v57 = vsel %vm347_vm2, %v528_v56, 0.0 }
 0x2af   :  { %355 = vadd.xlane.f32.xlu0 %v354_v57 }
 0x322   :  { %v356_v58 = vpop.xlane.xlu0 %355 }
 0x323   :  { %529 = vrcp.f32 %v356_v58  ;;  %v368_v62 = vand.u32 2147483648, %v356_v58  ;;  %v366_v0 = vand.u32 2147483647, %v356_v58  ;;  %vm362_vm4 = vweird.f32 %v356_v58 }
 0x325   :  { %v369_v2 = vor.u32 1.1754944e-38, %v368_v62  ;;  %vm367_vm6 = vcmp.eq.f32.partialorder %v366_v0, 8.507059e+37 }
 0x329   :  { %v530_v59 = vpop.eup %529 }
 0x32a   :  { %v358_v60 = vmul.f32 %v530_v59, %v356_v58  ;;  %vm363_vm3 = vweird.f32 %v530_v59 }
 0x32b   :  { %vm364_vm5 = vmor %vm362_vm4, %vm363_vm3 }
 0x32c   :  { %v359_v61 = vsub.f32 1.0, %v358_v60 }
 0x32e   :  { %v360_v63 = vmul.f32 %v530_v59, %v359_v61 }
 0x330   :  { %v361_v1 = vadd.f32 %v530_v59, %v360_v63 }
 0x332   :  { %v365_v3 = vsel %vm364_vm5, %v530_v59, %v361_v1 }
 0x333   :  { %v370_v4 = vsel %vm367_vm6, %v369_v2, %v365_v3 }
 0x334   :  { %v371_v5 = vmul.f32 %v528_v56, %v370_v4 }
 0x336   :  { %372 = vst [vmem:[#allocation8] sm:$0x3] %v371_v5 }
 0x337   :  { %383 = dma.vmem_to_hbm [thread:$0]  %s379_s23, 32, %s381_s26, [#allocation4]  }
 0x338   :  { %631 = dma.done.wait [#allocation4], 32  }
 0x339   :  { %632 = vsyncadd [#allocation4], 4294967264 }
 0x33a   :  { %388 = vsyncpa [#allocation3], 1 }
 0x33b   :  { %389 = vsyncpa [#allocation6], 1 }
 0x33c   :  { %390 = vsyncpa [#allocation4], 1 }

</bundles_post_ra>
